<compile_context>
chip_gen: v7x
topology: tpu7x:2x2x1
jax: 0.10.0
libtpu: 0.0.40
codegen_flags: <defaults>
</compile_context>

<pallas_src>
import jax
import jax.numpy as jnp
import numpy as np
from jax.experimental import pallas as pl
from jax.experimental.pallas import tpu as pltpu


def _round_up(x, m):
    return (x + m - 1) // m * m


def _csl_kernel(gb_ref, x_ref, wl_ref, out_ref):
    # gb_ref : (bt, 2, dim_out) f32 -- row 0 = sigmoid(gate), row 1 = bl*gate + hyper_bias
    # x_ref  : (bt, nt, dim_in)
    # wl_ref : (dim_in, dim_out)   grid-invariant
    # out_ref: (bt, nt, dim_out)   last dim == full dim_out (no padding, no post-slice)
    bt, nt, dim_in = x_ref.shape
    dim_out = wl_ref.shape[1]

    # 2-D MXU matmul with f32 accumulation; the (bt, nt) <-> (bt*nt,) reshapes are
    # layout-preserving (bt == 1, or nt % 8 == 0 by construction in the wrapper).
    x2 = x_ref[...].reshape(bt * nt, dim_in)
    h = jnp.dot(x2, wl_ref[...], preferred_element_type=jnp.float32)
    h = h.reshape(bt, nt, dim_out)

    gb = gb_ref[...].astype(jnp.float32)
    gate = gb[:, 0:1, :]          # (bt, 1, dim_out) -> broadcast over rows
    fbias = gb[:, 1:2, :]
    out_ref[...] = (h * gate + fbias).astype(out_ref.dtype)


def prepare_params(params):
    """One-time weight prep (outside the forward path): transpose PyTorch-layout
    (out, in) weights to (in, out) and concatenate the two hyper-net weights so the
    gate/bias hyper-GEMM can be issued as a single matmul."""
    dim_out = params["layer_w"].shape[0]
    return {
        "dim_out": dim_out,                                        # python int (static)
        "wl": jnp.asarray(params["layer_w"]).T,                    # (dim_in, dim_out)
        "bl": jnp.asarray(params["layer_b"]),                      # (dim_out,)
        "wgb": jnp.concatenate([jnp.asarray(params["gate_w"]).T,   # (dim_ctx, 2*dim_out)
                                jnp.asarray(params["bias_w"]).T], axis=1),
        "bg": jnp.asarray(params["gate_b"]),                       # (dim_out,)
    }


def concat_squash_linear(ctx, x, prep, *, row_tile=2048, compute_dtype=None):
    """ctx: (B, 1, dim_ctx), x: (B, N, dim_in) -> (B, N, dim_out).

    row_tile:      rows of x per kernel step (default 2048; mem-bound sweet spot).
    compute_dtype: e.g. jnp.bfloat16 on v6e/v7x to halve HBM traffic on the x / wl
                   streams (f32 accumulation is preserved; output keeps x's dtype).
    """
    B, N, dim_in = x.shape
    dim_out = prep["dim_out"]
    out_dtype = x.dtype

    # --- Hoisted hyper-gate / hyper-bias: ONE fused (B,dim_ctx)x(dim_ctx,2*dim_out)
    #     GEMM, layer bias folded in.  (Done once per forward pass, not per tile.) ---
    ctx2 = ctx.reshape(B, -1).astype(jnp.float32)
    hyper = ctx2 @ prep["wgb"].astype(jnp.float32)                       # (B, 2*dim_out)
    gate = jax.nn.sigmoid(hyper[:, :dim_out] + prep["bg"].astype(jnp.float32))
    fbias = prep["bl"].astype(jnp.float32) * gate + hyper[:, dim_out:]   # bl folded here
    gb = jnp.stack([gate, fbias], axis=1)                                # (B, 2, dim_out)

    wl = prep["wl"]
    if compute_dtype is not None:
        x = x.astype(compute_dtype)
        wl = wl.astype(compute_dtype)

    # --- Main fused GEMM + gate/bias epilogue. ---
    if N < 128 and B > 1 and N % 8 == 0:
        # Small-N / many-batch regime: pack ~row_tile/N batches per grid step so the
        # ~600-cycle per-step overhead is amortized over a full MXU-sized matmul.
        bpt = max(1, min(B, row_tile // N))
        grid = (pl.cdiv(B, bpt),)
        in_specs = [
            pl.BlockSpec((bpt, 2, dim_out), lambda j: (j, 0, 0)),        # gate/bias pack
            pl.BlockSpec((bpt, N, dim_in), lambda j: (j, 0, 0)),         # x (bpt batches)
            pl.BlockSpec((dim_in, dim_out), lambda j: (0, 0)),           # wl (invariant)
        ]
        out_spec = pl.BlockSpec((bpt, N, dim_out), lambda j: (j, 0, 0))
        dims = ("parallel",)
    else:
        # (batch, row-tile) grid; both axes parallel so v7x's two TCs share work.
        if N <= row_tile:
            tm = N                                   # full dim -> always legal
        else:
            tm = min(N, _round_up(row_tile, 8))      # keep sublane-aligned tiles
        grid = (B, pl.cdiv(N, tm))
        in_specs = [
            pl.BlockSpec((1, 2, dim_out), lambda b, j: (b, 0, 0)),       # gate/bias pack
            pl.BlockSpec((1, tm, dim_in), lambda b, j: (b, j, 0)),       # x row tile
            pl.BlockSpec((dim_in, dim_out), lambda b, j: (0, 0)),        # wl (invariant)
        ]
        out_spec = pl.BlockSpec((1, tm, dim_out), lambda b, j: (b, j, 0))
        dims = ("parallel", "parallel")

    return pl.pallas_call(
        _csl_kernel,
        out_shape=jax.ShapeDtypeStruct((B, N, dim_out), out_dtype),
        grid_spec=pltpu.PrefetchScalarGridSpec(
            num_scalar_prefetch=0,
            grid=grid,
            in_specs=in_specs,
            out_specs=out_spec,
        ),
        compiler_params=pltpu.CompilerParams(
            dimension_semantics=dims,
            vmem_limit_bytes=32 * 1024 * 1024,   # <= 32 MiB: safe on v7x's 64 MiB VMEM
        ),
    )(gb, x, wl)


def init_params(key, dim_in, dim_out, dim_ctx, dtype=jnp.float32):
    """Deterministic init mimicking nn.Linear's uniform(-1/sqrt(fan_in), 1/sqrt(fan_in)),
    stored in PyTorch layout (out_features, in_features)."""
    ks = jax.random.split(key, 5)

    def u(k, shape, fan_in):
        bound = 1.0 / np.sqrt(fan_in)
        return jax.random.uniform(k, shape, dtype, minval=-bound, maxval=bound)

    return {
        "layer_w": u(ks[0], (dim_out, dim_in), dim_in),
        "layer_b": u(ks[1], (dim_out,), dim_in),
        "gate_w":  u(ks[2], (dim_out, dim_ctx), dim_ctx),
        "gate_b":  u(ks[3], (dim_out,), dim_ctx),
        "bias_w":  u(ks[4], (dim_out, dim_ctx), dim_ctx),
    }


def reference(ctx, x, p):
    gate = jax.nn.sigmoid(ctx @ p["gate_w"].T + p["gate_b"])
    bias = ctx @ p["bias_w"].T
    return (x @ p["layer_w"].T + p["layer_b"]) * gate + bias


if __name__ == "__main__":
    B, dim_in, dim_out, dim_ctx = 2, 32, 32, 4

    key = jax.random.PRNGKey(0)
    kx, kc, kw = jax.random.split(key, 3)
    params = init_params(kw, dim_in, dim_out, dim_ctx)
    prep = prepare_params(params)  # one-time weight transpose + hyper-weight concat

    # Test 1: tiny N -> batch-packed path (all batches handled in one grid step).
    N = 8
    x = jax.random.normal(kx, (B, N, dim_in), jnp.float32)
    ctx = jax.random.normal(kc, (B, 1, dim_ctx), jnp.float32)
    out = jax.block_until_ready(concat_squash_linear(ctx, x, prep))
    ref = reference(ctx, x, params)
    assert out.shape == (B, N, dim_out)
    np.testing.assert_allclose(np.asarray(out), np.asarray(ref), rtol=1e-5, atol=1e-5)

    # Test 2: (batch, row-tile) grid with multiple tiles and a partial last tile.
    N2 = 300
    kx2, kc2 = jax.random.split(jax.random.PRNGKey(1))
    x2 = jax.random.normal(kx2, (B, N2, dim_in), jnp.float32)
    ctx2 = jax.random.normal(kc2, (B, 1, dim_ctx), jnp.float32)
    out2 = jax.block_until_ready(concat_squash_linear(ctx2, x2, prep, row_tile=128))
    ref2 = reference(ctx2, x2, params)
    assert out2.shape == (B, N2, dim_out)
    np.testing.assert_allclose(np.asarray(out2), np.asarray(ref2), rtol=1e-5, atol=1e-5)

    # Test 3: bf16 input streams (v6e/v7x fast path); f32 accumulation, looser tolerance.
    out3 = jax.block_until_ready(
        concat_squash_linear(ctx2, x2, prep, compute_dtype=jnp.bfloat16))
    np.testing.assert_allclose(np.asarray(out3), np.asarray(ref2), rtol=3e-2, atol=3e-2)

    print("KERNEL_OK")
</pallas_src>

<mosaic_0001>
module attributes {stable_mosaic.version = 11 : i64} {
  func.func @_csl_kernel(%arg0: i32, %arg1: memref<2x2x32xf32, #tpu.memory_space<vmem>>, %arg2: memref<2x8x32xf32, #tpu.memory_space<vmem>>, %arg3: memref<32x32xf32, #tpu.memory_space<vmem>>, %arg4: memref<2x8x32xf32, #tpu.memory_space<vmem>>) attributes {dimension_semantics = [#tpu.dimension_semantics<parallel>], iteration_bounds = array<i64: 1>, scalar_prefetch = 0 : i64, scratch_operands = 0 : i64, tpu.core_type = #tpu.core_type<tc>, window_params = [{transform_indices = @transform_0, window_bounds = array<i64: 2, 2, 32>}, {transform_indices = @transform_1, window_bounds = array<i64: 2, 8, 32>}, {pipeline_mode = #tpu.pipeline_mode<synchronous>, transform_indices = @transform_2, window_bounds = array<i64: 32, 32>}, {transform_indices = @transform_3, window_bounds = array<i64: 2, 8, 32>}]} {
    %c0 = arith.constant 0 : index
    %c0_0 = arith.constant 0 : index
    %c0_1 = arith.constant 0 : index
    %0 = vector.load %arg2[%c0, %c0_0, %c0_1] : memref<2x8x32xf32, #tpu.memory_space<vmem>>, vector<2x8x32xf32>
    %1 = vector.shape_cast %0 : vector<2x8x32xf32> to vector<16x32xf32>
    %c0_2 = arith.constant 0 : index
    %c0_3 = arith.constant 0 : index
    %2 = vector.load %arg3[%c0_2, %c0_3] : memref<32x32xf32, #tpu.memory_space<vmem>>, vector<32x32xf32>
    %cst = arith.constant dense<0.000000e+00> : vector<16x32xf32>
    %3 = tpu.matmul %1, %2, %cst {dimension_numbers = #tpu.dot_dimension_numbers<[1], [0], [0], [1], [0, 0, 1, 1], [], []>} : vector<16x32xf32>, vector<32x32xf32>, vector<16x32xf32> -> vector<16x32xf32>
    %4 = vector.shape_cast %3 : vector<16x32xf32> to vector<2x8x32xf32>
    %c0_4 = arith.constant 0 : index
    %c0_5 = arith.constant 0 : index
    %c0_6 = arith.constant 0 : index
    %5 = vector.load %arg1[%c0_4, %c0_5, %c0_6] : memref<2x2x32xf32, #tpu.memory_space<vmem>>, vector<2x2x32xf32>
    %6 = vector.extract_strided_slice %5 {offsets = [0, 0, 0], sizes = [2, 1, 32], strides = [1, 1, 1]} : vector<2x2x32xf32> to vector<2x1x32xf32>
    %7 = vector.extract_strided_slice %5 {offsets = [0, 1, 0], sizes = [2, 1, 32], strides = [1, 1, 1]} : vector<2x2x32xf32> to vector<2x1x32xf32>
    %8 = vector.broadcast %6 : vector<2x1x32xf32> to vector<2x8x32xf32>
    %9 = arith.mulf %4, %8 : vector<2x8x32xf32>
    %10 = vector.broadcast %7 : vector<2x1x32xf32> to vector<2x8x32xf32>
    %11 = arith.addf %9, %10 : vector<2x8x32xf32>
    %c0_7 = arith.constant 0 : index
    %c0_8 = arith.constant 0 : index
    %c0_9 = arith.constant 0 : index
    %12 = vector.load %arg4[%c0_7, %c0_8, %c0_9] : memref<2x8x32xf32, #tpu.memory_space<vmem>>, vector<2x8x32xf32>
    tpu.vector_store %arg4[%c0_7, %c0_8, %c0_9], %11 {strides = array<i32>} : memref<2x8x32xf32, #tpu.memory_space<vmem>>, vector<2x8x32xf32>,
    return
  }
  func.func @transform_0(%arg0: i32) -> (i32, i32, i32) {
    %c0_i32 = arith.constant 0 : i32
    %c0_i32_0 = arith.constant 0 : i32
    %c0_i32_1 = arith.constant 0 : i32
    return %arg0, %c0_i32, %c0_i32_0 : i32, i32, i32
  }
  func.func @transform_1(%arg0: i32) -> (i32, i32, i32) {
    %c0_i32 = arith.constant 0 : i32
    %c0_i32_0 = arith.constant 0 : i32
    %c0_i32_1 = arith.constant 0 : i32
    return %arg0, %c0_i32, %c0_i32_0 : i32, i32, i32
  }
  func.func @transform_2(%arg0: i32) -> (i32, i32) {
    %c0_i32 = arith.constant 0 : i32
    %c0_i32_0 = arith.constant 0 : i32
    %c0_i32_1 = arith.constant 0 : i32
    return %c0_i32, %c0_i32_0 : i32, i32
  }
  func.func @transform_3(%arg0: i32) -> (i32, i32, i32) {
    %c0_i32 = arith.constant 0 : i32
    %c0_i32_0 = arith.constant 0 : i32
    %c0_i32_1 = arith.constant 0 : i32
    return %arg0, %c0_i32, %c0_i32_0 : i32, i32, i32
  }
}

</mosaic_0001>

<bundles_post_ra>
// kernel: tpu_custom_call.1
= control target key start
LH: loop header
LB: loop body
LE: loop exit
PB: predicated region body
PF: predicated region fallthrough
CT: control target
= control target key end

     0   :  { %8 = vsyncpa [#allocation3], 0  ;;  %s404_s0 = inlined_call_operand.hbm [shape: f32[2,2,32], index: 0, kind: input, shape index: {}]   ;;  %s405_s1 = inlined_call_operand.hbm [shape: f32[2,8,32], index: 1, kind: input, shape index: {}]   ;;  %s406_s2 = inlined_call_operand.hbm [shape: f32[32,32], index: 2, kind: input, shape index: {}]   ;;  %s407_s3 = inlined_call_operand.hbm [shape: f32[2,8,32], index: 3, kind: output, shape index: {}]  }
   0x1   :  { %9 = vsyncpa [#allocation6], 0 }
   0x2   :  { %10 = vsyncpa [#allocation4], 0  ;;  %s315_s12 = smov [#allocation5]   ;;  %s221_s16 = scalar_lea.hbm %s405_s1, 256 }
   0x3   :  { %s28_s13 = sshll.u32 %s315_s12, 4  ;;  %p222_p0 = scmp.ne.s32.totalorder %s405_s1, %s221_s16  ;;  %s29_s13 = int_to_ptr.vmem [resolvable:$true] %s28_s13 }
   0x4   :  { %p225_p1 = scmp.lt.u32.totalorder %s221_s16, %s405_s1 }
   0x6   :  { %p227_p2 = pnand %p225_p1, %p222_p0 }
   0x8   :  { %230 = shalt.err (!%p227_p2)
}
   0x9   :  { %s231_s21 = scalar_lea.vmem %s29_s13, 256  ;;  %p236_p4 = scmp.lt.s32.totalorder %s29_s13, %s29_s13 }
   0xa   :  { %p232_p3 = scmp.ne.s32.totalorder %s29_s13, %s231_s21  ;;  %p237_p5 = scmp.lt.s32.totalorder %s231_s21, %s231_s21 }
   0xc   :  { %p238_p6 = por %p237_p5, %p236_p4 }
   0xe   :  { %p239_p7 = pnand %p238_p6, %p232_p3 }
  0x10   :  { %242 = shalt.err (!%p239_p7)
}
  0x11   :  { %s316_s22 = smov 128   ;;  %s317_s23 = smov 8  }
  0x12   :  { %34 = dma.hbm_to_vmem [thread:$0]  %s405_s1, 256, %s29_s13, [#allocation6], %s316_s22, %s316_s22, %s317_s23  }
  0x13   :  { %s318_s26 = smov [#allocation2]   ;;  %s243_s30 = scalar_lea.hbm %s404_s0, 64 }
  0x14   :  { %s16_s27 = sshll.u32 %s318_s26, 4  ;;  %p244_p8 = scmp.ne.s32.totalorder %s404_s0, %s243_s30  ;;  %s17_s27 = int_to_ptr.vmem [resolvable:$true] %s16_s27 }
  0x15   :  { %p247_p9 = scmp.lt.u32.totalorder %s243_s30, %s404_s0 }
  0x17   :  { %p249_p10 = pnand %p247_p9, %p244_p8 }
  0x19   :  { %252 = shalt.err (!%p249_p10)
}
  0x1a   :  { %s253_s8 = scalar_lea.vmem %s17_s27, 64  ;;  %p258_p12 = scmp.lt.s32.totalorder %s17_s27, %s17_s27 }
  0x1b   :  { %p254_p11 = scmp.ne.s32.totalorder %s17_s27, %s253_s8  ;;  %p259_p13 = scmp.lt.s32.totalorder %s253_s8, %s253_s8 }
  0x1d   :  { %p260_p0 = por %p259_p13, %p258_p12 }
  0x1f   :  { %p261_p1 = pnand %p260_p0, %p254_p11 }
  0x21   :  { %264 = shalt.err (!%p261_p1)
}
  0x22   :  { %s319_s1 = smov 32   ;;  %s320_s9 = smov 2  }
  0x23   :  { %22 = dma.hbm_to_vmem [thread:$0]  %s404_s0, 64, %s17_s27, [#allocation3], %s319_s1, %s319_s1, %s320_s9  }
  0x24   :  { %s321_s12 = smov [#allocation7]   ;;  %s265_s16 = scalar_lea.hbm %s406_s2, 512 }
  0x25   :  { %s40_s13 = sshll.u32 %s321_s12, 4  ;;  %p266_p2 = scmp.ne.s32.totalorder %s406_s2, %s265_s16  ;;  %s41_s13 = int_to_ptr.vmem [resolvable:$true] %s40_s13 }
  0x26   :  { %p269_p3 = scmp.lt.u32.totalorder %s265_s16, %s406_s2 }
  0x28   :  { %p271_p4 = pnand %p269_p3, %p266_p2 }
  0x2a   :  { %274 = shalt.err (!%p271_p4)
}
  0x2b   :  { %s275_s21 = scalar_lea.vmem %s41_s13, 512  ;;  %p280_p6 = scmp.lt.s32.totalorder %s41_s13, %s41_s13 }
  0x2c   :  { %p276_p5 = scmp.ne.s32.totalorder %s41_s13, %s275_s21  ;;  %p281_p7 = scmp.lt.s32.totalorder %s275_s21, %s275_s21 }
  0x2e   :  { %p282_p8 = por %p281_p7, %p280_p6 }
  0x30   :  { %p283_p9 = pnand %p282_p8, %p276_p5 }
  0x32   :  { %286 = shalt.err (!%p283_p9)
}
  0x33   :  { %46 = dma.hbm_to_vmem [thread:$0]  %s406_s2, 512, %s41_s13, [#allocation6], %s316_s22, %s316_s22, %s317_s23  }
  0x34   :  { %309 = dma.done.wait [#allocation3], 64  }
  0x35   :  { %310 = vsyncadd [#allocation3], 4294967232 }
  0x36   :  { %311 = dma.done.wait [#allocation6], 768  }
  0x37   :  { %312 = vsyncadd [#allocation6], 4294966528  ;;  %vm62_vm0 = vcmask 261120   ;;  %v58_v0 = vld [vmem:[#allocation7] sm:$0xff]  ;;  %v59_v1 = vld [vmem:[#allocation7 + $0x8] sm:$0xff]  ;;  %v146_v8 = vlaneseq  ;;  %s322_s2 = smov [#allocation8]  }
  0x38   :  { %v60_v2 = vld [vmem:[#allocation7 + $0x10] sm:$0xff]  ;;  %v205_v3 = vpack.c.bf16 %v59_v1, %v58_v0  ;;  %v61_v4 = vld [vmem:[#allocation7 + $0x18] sm:$0xff]  ;;  %v145_v11 = vld [vmem:[#allocation2 + $0x2] sm:$0x3]  ;;  %s173_s25 = sshll.u32 %s322_s2, 4  ;;  %s174_s25 = int_to_ptr.vmem [resolvable:$true] %s173_s25 }
  0x39   :  { %v56_v5 = vld [vmem:[#allocation5] sm:$0xff]  ;;  %v209_v6 = vpack.c.bf16 %v61_v4, %v60_v2  ;;  %v57_v7 = vld [vmem:[#allocation5 + $0x8] sm:$0xff]  ;;  %v147_v9 = vshrl.u32 %v146_v8, 7  ;;  %v144_v13 = vld [vmem:[#allocation2] sm:$0x3]  ;;  %s287_s26 = scalar_lea.vmem %s174_s25, 256  ;;  %p292_p11 = scmp.lt.s32.totalorder %s174_s25, %s174_s25 }
  0x3a   :  { %202 = vmatprep.mubr.msk.f32.mxu0 %vm62_vm0, %v56_v5  ;;  %206 = vmatprep.subr.bf16.mxu0 %v205_v3  ;;  %p288_p10 = scmp.ne.s32.totalorder %s174_s25, %s287_s26  ;;  %p293_p12 = scmp.lt.s32.totalorder %s287_s26, %s287_s26 }
  0x3b   :  { %208 = vmatpush3.bf16.msra.mxu0 %v205_v3  ;;  %v148_v10 = vsub.s32 0, %v147_v9  ;;  %v158_v12 = vsub.s32 1, %v147_v9 }
  0x3c   :  { %210 = vmatprep.subr.bf16.mxu0 %v209_v6  ;;  %p294_p13 = por %p293_p12, %p292_p11 }
  0x3d   :  { %v153_v14 = vrot.slane %v145_v11, %v148_v10  ;;  %v149_v15 = vrot.slane %v144_v13, %v148_v10  ;;  %v163_v16 = vrot.slane %v145_v11, %v158_v12  ;;  %v159_v18 = vrot.slane %v144_v13, %v158_v12 }
  0x3e   :  { %p295_p0 = pnand %p294_p13, %p288_p10 }
  0x3f   :  { %212 = vmatpush3.bf16.msra.mxu0 %v209_v6 }
  0x42   :  { %203 = vmatmul.mubr.msk.f32.vlgmr.msra.gmra.mrb[0].mxu0 %vm62_vm0, %v57_v7 }
 0x115   :  { %v204_v17 = vpop.f32.mrb[0].mxu0 }
 0x116   :  { %v155_v19 = vmul.f32 %v204_v17, %v153_v14  ;;  %v135_v20 = vpop.f32.mrb[1].mxu0 }
 0x117   :  { %v154_v21 = vmul.f32 %v149_v15, %v135_v20 }
 0x118   :  { %v165_v22 = vadd.f32 %v163_v16, %v155_v19 }
 0x119   :  { %v164_v23 = vadd.f32 %v159_v18, %v154_v21 }
 0x11a   :  { %167 = vst.msk [vmem:[#allocation8 + $0x8] sm:$0xff] %vm62_vm0, %v165_v22 }
 0x11b   :  { %166 = vst.msk [vmem:[#allocation8] sm:$0xff] %vm62_vm0, %v164_v23 }
 0x11c   :  { %298 = shalt.err (!%p295_p0)
}
 0x11d   :  { %s299_s29 = scalar_lea.hbm %s407_s3, 256 }
 0x11e   :  { %p300_p1 = scmp.ne.s32.totalorder %s407_s3, %s299_s29  ;;  %p303_p2 = scmp.lt.u32.totalorder %s299_s29, %s407_s3 }
 0x120   :  { %p305_p3 = pnand %p303_p2, %p300_p1 }
 0x122   :  { %308 = shalt.err (!%p305_p3)
}
 0x123   :  { %179 = dma.vmem_to_hbm [thread:$0]  %s174_s25, 256, %s407_s3, [#allocation4], %s316_s22, %s316_s22, %s317_s23  }
 0x124   :  { %313 = dma.done.wait [#allocation4], 256  }
 0x125   :  { %314 = vsyncadd [#allocation4], 4294967040 }
 0x126   :  { %183 = vsyncpa [#allocation3], 1 }
 0x127   :  { %184 = vsyncpa [#allocation6], 1 }
 0x128   :  { %185 = vsyncpa [#allocation4], 1 }

</bundles_post_ra>
